<compile_context>
chip_gen: v7x
topology: tpu7x:2x2x1
jax: 0.10.0
libtpu: 0.0.40
codegen_flags: <defaults>
</compile_context>

<pallas_src>
import functools

import jax
import jax.numpy as jnp
from jax.experimental import pallas as pl
from jax.experimental.pallas import tpu as pltpu

NUM_CLASSES = 24

COUT_PAD = 128   # padded conv output channels (Cout = 32 -> 128), lane-dense
NC_PAD = 128     # padded num_classes (24 -> 128), lane-dense kernel output


def conv_pool_fc_kernel(patches_ref, w_ref, b_ref, wfc_ref, bfc_ref,
                        out_ref, acc_ref, *, tm, inv_hw):
    """One grid step = one (batch, spatial-tile).

    patches_ref: [1, tm, K]          bf16   im2col rows (K = Cin*9, UNPADDED)
    w_ref:       [K, COUT_PAD]       bf16   conv weights (resident)
    b_ref:       [1, COUT_PAD]       f32    conv bias (zero-padded)
    wfc_ref:     [COUT_PAD, NC_PAD]  bf16   FC weights (zero-padded)
    bfc_ref:     [1, NC_PAD]         f32    FC bias (zero-padded)
    out_ref:     [1, 8, NC_PAD]      f32    logits (sublane row 0 is valid)
    acc_ref:     [8, COUT_PAD]       f32    per-sublane partial pooled sums
    """
    m = pl.program_id(1)

    @pl.when(m == 0)
    def _init():
        acc_ref[...] = jnp.zeros_like(acc_ref)

    # conv-as-GEMM on the MXU (bf16 operands, f32 accumulation) + fused ReLU.
    h = jnp.dot(patches_ref[0], w_ref[...], preferred_element_type=jnp.float32)
    h = jnp.maximum(h + b_ref[...], 0.0)                       # [tm, COUT_PAD]

    # fused global-average-pool: per-sublane partial sums (VPU adds only).
    if tm % 8 == 0:
        acc_ref[...] += h.reshape(tm // 8, 8, COUT_PAD).sum(axis=0)
    else:
        # rare fallback for tiles not divisible by 8 (block == full HW case)
        acc_ref[0:1, :] = acc_ref[0:1, :] + jnp.sum(h, axis=0, keepdims=True)

    @pl.when(m == pl.num_programs(1) - 1)
    def _finalize():
        pooled = jnp.sum(acc_ref[...], axis=0, keepdims=True) * inv_hw  # [1, COUT_PAD]
        pooled = jnp.broadcast_to(pooled, (8, COUT_PAD)).astype(jnp.bfloat16)
        logits = jnp.dot(pooled, wfc_ref[...],
                         preferred_element_type=jnp.float32) + bfc_ref[...]
        out_ref[0] = logits                                    # [8, NC_PAD]


def _im2col_3x3_pad1(x):
    """x: [B, C, H, W] NCHW -> bf16 patches [B, H*W, 9*C]; K-column order (kh, kw, c).

    NHWC-first so the transpose happens on the small raw tensor (in bf16),
    and the 9x expansion is a pure reshape afterwards.
    """
    B, C, H, W = x.shape
    xh = jnp.transpose(x, (0, 2, 3, 1)).astype(jnp.bfloat16)   # [B, H, W, C]
    xp = jnp.pad(xh, ((0, 0), (1, 1), (1, 1), (0, 0)))
    taps = [xp[:, kh:kh + H, kw:kw + W, :] for kh in range(3) for kw in range(3)]
    patches = jnp.stack(taps, axis=3)                          # [B, H, W, 9, C]
    return patches.reshape(B, H * W, 9 * C)


def _pick_spatial_tile(hw, cap=1024):
    """Largest legal spatial tile: full HW if small, else an 8-aligned divisor <= cap."""
    if hw <= cap:
        return hw
    for t in range(cap, 7, -8):                                # multiples of 8
        if hw % t == 0:
            return t
    # TODO(synk): remainder-tile masking for HW with no 8-aligned divisor <= cap
    #             (falls back to one whole-HW block; VMEM risk only for huge HW).
    return hw


def cnn_forward(x, params):
    """x: [B, Cin, H, W] float32 (NCHW).  Returns logits [B, NUM_CLASSES]."""
    B, Cin, H, W = x.shape
    conv_w, conv_b, fc_w, fc_b = params
    Cout = conv_w.shape[0]
    K = Cin * 9
    HW = H * W

    tm = _pick_spatial_tile(HW)
    num_m = HW // tm

    # --- im2col (plain-JAX glue), bf16, UNPADDED K ---
    patches = _im2col_3x3_pad1(x)                              # [B, HW, K] bf16

    # --- parameters; only the lane (output) dims are zero-padded to 128 ---
    # K-column order (kh, kw, c) must match the patches layout.
    w2d = conv_w.transpose(2, 3, 1, 0).reshape(K, Cout).astype(jnp.bfloat16)
    w2d = jnp.pad(w2d, ((0, 0), (0, COUT_PAD - Cout)))                     # [K, COUT_PAD]
    b2d = jnp.pad(conv_b.reshape(1, Cout), ((0, 0), (0, COUT_PAD - Cout)))  # [1, COUT_PAD] f32
    wfc = jnp.pad(fc_w.astype(jnp.bfloat16),
                  ((0, COUT_PAD - Cout), (0, NC_PAD - NUM_CLASSES)))        # [COUT_PAD, NC_PAD]
    bfc = jnp.pad(fc_b.reshape(1, NUM_CLASSES),
                  ((0, 0), (0, NC_PAD - NUM_CLASSES)))                      # [1, NC_PAD] f32

    kernel = functools.partial(conv_pool_fc_kernel, tm=tm, inv_hw=1.0 / HW)

    cost = pl.CostEstimate(
        flops=2 * B * HW * K * COUT_PAD + 2 * B * 8 * COUT_PAD * NC_PAD,
        transcendentals=0,
        bytes_accessed=(patches.size * 2 + w2d.size * 2 + b2d.size * 4
                        + wfc.size * 2 + bfc.size * 4 + B * 8 * NC_PAD * 4),
    )

    out = pl.pallas_call(
        kernel,
        out_shape=jax.ShapeDtypeStruct((B, 8, NC_PAD), jnp.float32),
        grid_spec=pltpu.PrefetchScalarGridSpec(
            num_scalar_prefetch=0,
            grid=(B, num_m),
            in_specs=[
                pl.BlockSpec((1, tm, K), lambda b, m: (b, m, 0)),       # patches (K unpadded)
                pl.BlockSpec((K, COUT_PAD), lambda b, m: (0, 0)),       # conv W (resident)
                pl.BlockSpec((1, COUT_PAD), lambda b, m: (0, 0)),       # conv b
                pl.BlockSpec((COUT_PAD, NC_PAD), lambda b, m: (0, 0)),  # fc W (resident)
                pl.BlockSpec((1, NC_PAD), lambda b, m: (0, 0)),         # fc b
            ],
            out_specs=pl.BlockSpec((1, 8, NC_PAD), lambda b, m: (b, 0, 0)),
            scratch_shapes=[pltpu.VMEM((8, COUT_PAD), jnp.float32)],
        ),
        compiler_params=pltpu.CompilerParams(
            dimension_semantics=("parallel", "arbitrary"),
            vmem_limit_bytes=32 * 1024 * 1024,
        ),
        cost_estimate=cost,
    )(patches, w2d, b2d, wfc, bfc)

    # Sublane row 0 of the 8-row block holds the logits; strip lane padding.
    return out[:, 0, :NUM_CLASSES]


def init_params(key, cin=4, cout=32, num_classes=NUM_CLASSES):
    k1, k2, k3, k4 = jax.random.split(key, 4)
    conv_w = 0.1 * jax.random.normal(k1, (cout, cin, 3, 3), jnp.float32)  # torch OIHW
    conv_b = 0.1 * jax.random.normal(k2, (cout,), jnp.float32)
    fc_w = 0.1 * jax.random.normal(k3, (cout, num_classes), jnp.float32)
    fc_b = 0.1 * jax.random.normal(k4, (num_classes,), jnp.float32)
    return conv_w, conv_b, fc_w, fc_b


if __name__ == "__main__":
    key = jax.random.PRNGKey(0)
    kx, kp = jax.random.split(key)

    # Small NCHW input consistent with a CNN classifier: batch=2, channels=4, 16x16.
    x = jax.random.normal(kx, (2, 4, 16, 16), jnp.float32)
    params = init_params(kp)

    logits = jax.jit(cnn_forward)(x, params)
    jax.block_until_ready(logits)

    assert logits.shape == (2, NUM_CLASSES) and logits.dtype == jnp.float32
    assert bool(jnp.all(jnp.isfinite(logits)))
    print("KERNEL_OK")
</pallas_src>

<mosaic_0001>
module attributes {stable_mosaic.version = 11 : i64} {
  func.func @conv_pool_fc_kernel(%arg0: i32, %arg1: i32, %arg2: memref<1x256x36xbf16, #tpu.memory_space<vmem>>, %arg3: memref<36x128xbf16, #tpu.memory_space<vmem>>, %arg4: memref<1x128xf32, #tpu.memory_space<vmem>>, %arg5: memref<128x128xbf16, #tpu.memory_space<vmem>>, %arg6: memref<1x128xf32, #tpu.memory_space<vmem>>, %arg7: memref<1x8x128xf32, #tpu.memory_space<vmem>>, %arg8: memref<8x128xf32, #tpu.memory_space<vmem>>) attributes {dimension_semantics = [#tpu.dimension_semantics<parallel>, #tpu.dimension_semantics<arbitrary>], iteration_bounds = array<i64: 2, 1>, scalar_prefetch = 0 : i64, scratch_operands = 1 : i64, tpu.core_type = #tpu.core_type<tc>, window_params = [{transform_indices = @transform_0, window_bounds = array<i64: 1, 256, 36>}, {pipeline_mode = #tpu.pipeline_mode<synchronous>, transform_indices = @transform_1, window_bounds = array<i64: 36, 128>}, {pipeline_mode = #tpu.pipeline_mode<synchronous>, transform_indices = @transform_2, window_bounds = array<i64: 1, 128>}, {pipeline_mode = #tpu.pipeline_mode<synchronous>, transform_indices = @transform_3, window_bounds = array<i64: 128, 128>}, {pipeline_mode = #tpu.pipeline_mode<synchronous>, transform_indices = @transform_4, window_bounds = array<i64: 1, 128>}, {transform_indices = @transform_5, window_bounds = array<i64: 1, 8, 128>}]} {
    %c0_i32 = arith.constant 0 : i32
    %0 = arith.cmpi eq, %arg1, %c0_i32 : i32
    %1 = arith.extui %0 : i1 to i32
    %c0_i32_0 = arith.constant 0 : i32
    %2 = arith.cmpi ne, %1, %c0_i32_0 : i32
    scf.if %2 {
      %cst_15 = arith.constant 0.000000e+00 : f32
      %20 = vector.broadcast %cst_15 : f32 to vector<8x128xf32>
      %c0_16 = arith.constant 0 : index
      %c0_17 = arith.constant 0 : index
      %21 = vector.load %arg8[%c0_16, %c0_17] : memref<8x128xf32, #tpu.memory_space<vmem>>, vector<8x128xf32>
      tpu.vector_store %arg8[%c0_16, %c0_17], %20 {strides = array<i32>} : memref<8x128xf32, #tpu.memory_space<vmem>>, vector<8x128xf32>,
    } else {
    }
    %c0 = arith.constant 0 : index
    %c0_1 = arith.constant 0 : index
    %c0_2 = arith.constant 0 : index
    %3 = vector.load %arg2[%c0, %c0_1, %c0_2] : memref<1x256x36xbf16, #tpu.memory_space<vmem>>, vector<1x256x36xbf16>
    %4 = vector.shape_cast %3 : vector<1x256x36xbf16> to vector<256x36xbf16>
    %c0_3 = arith.constant 0 : index
    %c0_4 = arith.constant 0 : index
    %5 = vector.load %arg3[%c0_3, %c0_4] : memref<36x128xbf16, #tpu.memory_space<vmem>>, vector<36x128xbf16>
    %cst = arith.constant dense<0.000000e+00> : vector<256x128xf32>
    %6 = tpu.matmul %4, %5, %cst {dimension_numbers = #tpu.dot_dimension_numbers<[1], [0], [0], [1], [0, 0, 1, 1], [], []>} : vector<256x36xbf16>, vector<36x128xbf16>, vector<256x128xf32> -> vector<256x128xf32>
    %c0_5 = arith.constant 0 : index
    %c0_6 = arith.constant 0 : index
    %7 = vector.load %arg4[%c0_5, %c0_6] : memref<1x128xf32, #tpu.memory_space<vmem>>, vector<1x128xf32>
    %8 = vector.broadcast %7 : vector<1x128xf32> to vector<256x128xf32>
    %9 = arith.addf %6, %8 : vector<256x128xf32>
    %cst_7 = arith.constant 0.000000e+00 : f32
    %10 = vector.broadcast %cst_7 : f32 to vector<256x128xf32>
    %11 = arith.maximumf %9, %10 : vector<256x128xf32>
    %c0_8 = arith.constant 0 : index
    %c0_9 = arith.constant 0 : index
    %12 = vector.load %arg8[%c0_8, %c0_9] : memref<8x128xf32, #tpu.memory_space<vmem>>, vector<8x128xf32>
    %13 = vector.shape_cast %11 : vector<256x128xf32> to vector<32x8x128xf32>
    %cst_10 = arith.constant dense<0.000000e+00> : vector<8x128xf32>
    %14 = vector.multi_reduction <add>, %13, %cst_10 [0] : vector<32x8x128xf32> to vector<8x128xf32>
    %15 = arith.addf %12, %14 : vector<8x128xf32>
    %c0_11 = arith.constant 0 : index
    %c0_12 = arith.constant 0 : index
    %16 = vector.load %arg8[%c0_11, %c0_12] : memref<8x128xf32, #tpu.memory_space<vmem>>, vector<8x128xf32>
    tpu.vector_store %arg8[%c0_11, %c0_12], %15 {strides = array<i32>} : memref<8x128xf32, #tpu.memory_space<vmem>>, vector<8x128xf32>,
    %c0_i32_13 = arith.constant 0 : i32
    %17 = arith.cmpi eq, %arg1, %c0_i32_13 : i32
    %18 = arith.extui %17 : i1 to i32
    %c0_i32_14 = arith.constant 0 : i32
    %19 = arith.cmpi ne, %18, %c0_i32_14 : i32
    scf.if %19 {
      %c0_15 = arith.constant 0 : index
      %c0_16 = arith.constant 0 : index
      %20 = vector.load %arg8[%c0_15, %c0_16] : memref<8x128xf32, #tpu.memory_space<vmem>>, vector<8x128xf32>
      %cst_17 = arith.constant dense<0.000000e+00> : vector<128xf32>
      %21 = vector.multi_reduction <add>, %20, %cst_17 [0] : vector<8x128xf32> to vector<128xf32>
      %22 = vector.shape_cast %21 : vector<128xf32> to vector<1x128xf32>
      %cst_18 = arith.constant 3.906250e-03 : f32
      %23 = vector.broadcast %cst_18 : f32 to vector<1x128xf32>
      %24 = arith.mulf %22, %23 : vector<1x128xf32>
      %25 = vector.shape_cast %24 : vector<1x128xf32> to vector<1x128xf32>
      %26 = vector.broadcast %25 : vector<1x128xf32> to vector<8x128xf32>
      %27 = arith.truncf %26 : vector<8x128xf32> to vector<8x128xbf16>
      %c0_19 = arith.constant 0 : index
      %c0_20 = arith.constant 0 : index
      %28 = vector.load %arg5[%c0_19, %c0_20] : memref<128x128xbf16, #tpu.memory_space<vmem>>, vector<128x128xbf16>
      %cst_21 = arith.constant dense<0.000000e+00> : vector<8x128xf32>
      %29 = tpu.matmul %27, %28, %cst_21 {dimension_numbers = #tpu.dot_dimension_numbers<[1], [0], [0], [1], [0, 0, 1, 1], [], []>} : vector<8x128xbf16>, vector<128x128xbf16>, vector<8x128xf32> -> vector<8x128xf32>
      %c0_22 = arith.constant 0 : index
      %c0_23 = arith.constant 0 : index
      %30 = vector.load %arg6[%c0_22, %c0_23] : memref<1x128xf32, #tpu.memory_space<vmem>>, vector<1x128xf32>
      %31 = vector.broadcast %30 : vector<1x128xf32> to vector<8x128xf32>
      %32 = arith.addf %29, %31 : vector<8x128xf32>
      %c0_24 = arith.constant 0 : index
      %c0_25 = arith.constant 0 : index
      %c0_26 = arith.constant 0 : index
      %33 = vector.load %arg7[%c0_24, %c0_25, %c0_26] : memref<1x8x128xf32, #tpu.memory_space<vmem>>, vector<1x8x128xf32>
      %34 = vector.shape_cast %33 : vector<1x8x128xf32> to vector<8x128xf32>
      %35 = vector.shape_cast %32 : vector<8x128xf32> to vector<1x8x128xf32>
      tpu.vector_store %arg7[%c0_24, %c0_25, %c0_26], %35 {strides = array<i32>} : memref<1x8x128xf32, #tpu.memory_space<vmem>>, vector<1x8x128xf32>,
    } else {
    }
    return
  }
  func.func @transform_0(%arg0: i32, %arg1: i32) -> (i32, i32, i32) {
    %c0_i32 = arith.constant 0 : i32
    %c0_i32_0 = arith.constant 0 : i32
    return %arg0, %arg1, %c0_i32 : i32, i32, i32
  }
  func.func @transform_1(%arg0: i32, %arg1: i32) -> (i32, i32) {
    %c0_i32 = arith.constant 0 : i32
    %c0_i32_0 = arith.constant 0 : i32
    %c0_i32_1 = arith.constant 0 : i32
    return %c0_i32, %c0_i32_0 : i32, i32
  }
  func.func @transform_2(%arg0: i32, %arg1: i32) -> (i32, i32) {
    %c0_i32 = arith.constant 0 : i32
    %c0_i32_0 = arith.constant 0 : i32
    %c0_i32_1 = arith.constant 0 : i32
    return %c0_i32, %c0_i32_0 : i32, i32
  }
  func.func @transform_3(%arg0: i32, %arg1: i32) -> (i32, i32) {
    %c0_i32 = arith.constant 0 : i32
    %c0_i32_0 = arith.constant 0 : i32
    %c0_i32_1 = arith.constant 0 : i32
    return %c0_i32, %c0_i32_0 : i32, i32
  }
  func.func @transform_4(%arg0: i32, %arg1: i32) -> (i32, i32) {
    %c0_i32 = arith.constant 0 : i32
    %c0_i32_0 = arith.constant 0 : i32
    %c0_i32_1 = arith.constant 0 : i32
    return %c0_i32, %c0_i32_0 : i32, i32
  }
  func.func @transform_5(%arg0: i32, %arg1: i32) -> (i32, i32, i32) {
    %c0_i32 = arith.constant 0 : i32
    %c0_i32_0 = arith.constant 0 : i32
    %c0_i32_1 = arith.constant 0 : i32
    return %arg0, %c0_i32, %c0_i32_0 : i32, i32, i32
  }
}

</mosaic_0001>

<bundles_post_ra>
// kernel: cnn_forward.1
= control target key start
LH: loop header
LB: loop body
LE: loop exit
PB: predicated region body
PF: predicated region fallthrough
CT: control target
= control target key end

     0   :  { %s1119_s18 = smov 0   ;;  %s1121_s19 = smov 0   ;;  %s1263_s0 = inlined_call_operand.vmem [shape: bf16[2,256,36], index: 0, kind: input, shape index: {}]   ;;  %s1264_s1 = inlined_call_operand.vmem [shape: bf16[36,128], index: 1, kind: input, shape index: {}]   ;;  %s1265_s2 = inlined_call_operand.vmem [shape: f32[1,128], index: 2, kind: input, shape index: {}]   ;;  %s1266_s3 = inlined_call_operand.vmem [shape: bf16[128,128], index: 3, kind: input, shape index: {}]   ;;  %s1267_s4 = inlined_call_operand.vmem [shape: f32[1,128], index: 4, kind: input, shape index: {}]   ;;  %s1268_s5 = inlined_call_operand.vmem [shape: f32[2,8,128], index: 5, kind: output, shape index: {}]  }
   0x1   :  { %s1123_s20 = smov 0  }
   0x2 LB: > { %s27_s21 = sadd.s32 1, %s1081_s19  ;;  %p871_p0 = scmp.ge.s32.totalorder %s1085_s20, 1  ;;  %s1085_s20 = sphi %s1123_s20, %s15_s20   ;;  %s1081_s19 = sphi %s1121_s19, %s1270_s19   ;;  %s1077_s18 = sphi %s1119_s18, %s1269_s18  }
   0x3   : > { %p29_p1 = scmp.ge.s32.totalorder %s27_s21, 2  ;;  %p206_p2 = scmp.lt.s32.totalorder %s1085_s20, 3 }
   0x5   : > { %s1272_s21 = smov (%p29_p1, %s27_s21), 0  ;;  %p207_p3 = pnand %p871_p0, %p206_p2 }
   0x6   : > { %v1036_v0 = vld [vmem:[%s1264_s1] sm:$0xff] (!%p207_p3)   ;;  %v1037_v1 = vld [vmem:[%s1264_s1 + $0x8] sm:$0xff] (!%p207_p3)   ;;  %p238_p4 = scmp.lt.s32.totalorder (!%p207_p3), %s1077_s18, 1  ;;  %v1038_v2 = vld [vmem:[%s1264_s1 + $0x10] ss:$0 sps:$4 sm:$0x33] (!%p207_p3)  }
   0x7   : > { %210 = sbr.rel (%p207_p3) target bundleno = 531 (0x213), region = 40  ;;  %951 = vmatprep.subr.bf16.mxu0 (!%p207_p3), %v1036_v0  ;;  %vm445_vm0 = vcmask (!%p207_p3), 1041408   ;;  %vm396_vm1 = vcmask (!%p207_p3), 293888   ;;  %v1055_v20 = vld [vmem:[%s1266_s3] sm:$0xff] (!%p207_p3)   ;;  %v1087_v21 = vmov (!%p207_p3), 0.0   ;;  %v1056_v22 = vld [vmem:[%s1266_s3 + $0x8] sm:$0xff] (!%p207_p3)  }
   0x8   : > { %952 = vmatpush3.bf16.msra.mxu0 (!%p207_p3), %v1036_v0  ;;  %v447_v4 = vsel (!%p207_p3), %vm445_vm0, %v1038_v2, 0  ;;  %989 = vmatprep.subr.bf16.mxu1 (!%p207_p3), %v1087_v21  ;;  %v1057_v23 = vld [vmem:[%s1266_s3 + $0x10] sm:$0xff] (!%p207_p3)   ;;  %v1058_v24 = vld [vmem:[%s1266_s3 + $0x18] sm:$0xff] (!%p207_p3)   ;;  %v1059_v25 = vld [vmem:[%s1266_s3 + $0x20] sm:$0xff] (!%p207_p3)   ;;  %vm1088_vm2 = vmmov (!%p207_p3), 0  }
   0x9   : > { %953 = vmatprep.subr.bf16.mxu0 (!%p207_p3), %v1037_v1  ;;  %990 = vmatpush3.bf16.msra.mxu1 (!%p207_p3), %v1055_v20  ;;  %v1060_v26 = vld [vmem:[%s1266_s3 + $0x28] sm:$0xff] (!%p207_p3)   ;;  %v1061_v27 = vld [vmem:[%s1266_s3 + $0x30] sm:$0xff] (!%p207_p3)   ;;  %v1062_v28 = vld [vmem:[%s1266_s3 + $0x38] sm:$0xff] (!%p207_p3)  }
   0xa   : > { %991 = vmatprep.subr.bf16.mxu1 (!%p207_p3), %v1087_v21  ;;  %1005 = vmatprep.mubr.msk.bf16.mxu1 (!%p207_p3), %vm1088_vm2, %v1087_v21  ;;  %v1213_v29 = vld [vmem:[%s1265_s2] ss:$0 sm:$0xff] (!%p207_p3) }
   0xc   : > { %954 = vmatpush3.bf16.msra.mxu0 (!%p207_p3), %v1037_v1 }
   0xd   : > { %1009 = vmatprep.subr.msk.bf16.mxu0 (!%p207_p3), %vm445_vm0, %v1038_v2  ;;  %992 = vmatpush3.bf16.msra.mxu1 (!%p207_p3), %v1056_v22 }
   0xe   : > { %s1274_s18 = smov (!%p238_p4, %s1077_s18), 1  ;;  %993 = vmatprep.subr.bf16.mxu1 %v1087_v21 }
   0xf   : > { %s922_s28 = sshll.u32 %s1274_s18, 7  ;;  %s874_s29 = sshll.u32 %s1274_s18, 3 }
  0x10   : > { %s1152_s6 = scalar_lea.vmem %s1263_s0, %s922_s28  ;;  %956 = vmatpush3.bf16.msra.mxu0 %v447_v4  ;;  %s250_s9 = scalar_lea.vmem %s1268_s5, %s874_s29 }
  0x11   : > { %v1039_v3 = vld [vmem:[%s1152_s6] sm:$0xff]   ;;  %v1040_v5 = vld [vmem:[%s1152_s6 + $0x8] sm:$0xff]   ;;  %v1041_v6 = vld [vmem:[%s1152_s6 + $0x10] sm:$0xff]   ;;  %994 = vmatpush3.bf16.msra.mxu1 %v1057_v23 }
  0x12   : > { %957 = vmatprep.mubr.msk.bf16.mxu0 %vm396_vm1, %v1039_v3  ;;  %v1042_v7 = vld [vmem:[%s1152_s6 + $0x18] sm:$0xff]   ;;  %v1043_v8 = vld [vmem:[%s1152_s6 + $0x20] sm:$0xff]   ;;  %v1044_v9 = vld [vmem:[%s1152_s6 + $0x28] sm:$0xff]   ;;  %995 = vmatprep.subr.bf16.mxu1 %v1087_v21 }
  0x13   : > { %958 = vmatmul.mubr.msk.bf16.vlgmr.msra.gmra.mrb[0].mxu0 %vm396_vm1, %v1040_v5  ;;  %v1045_v10 = vld [vmem:[%s1152_s6 + $0x30] sm:$0xff]   ;;  %v1046_v11 = vld [vmem:[%s1152_s6 + $0x38] sm:$0xff]   ;;  %v1047_v12 = vld [vmem:[%s1152_s6 + $0x40] sm:$0xff]  }
  0x14   : > { %961 = vmatprep.mubr.msk.bf16.mxu0 %vm396_vm1, %v1041_v6  ;;  %v1048_v13 = vld [vmem:[%s1152_s6 + $0x48] sm:$0xff]   ;;  %v1049_v14 = vld [vmem:[%s1152_s6 + $0x50] sm:$0xff]   ;;  %v1050_v15 = vld [vmem:[%s1152_s6 + $0x58] sm:$0xff]  }
  0x15   : > { %v1051_v16 = vld [vmem:[%s1152_s6 + $0x60] sm:$0xff]   ;;  %v1052_v17 = vld [vmem:[%s1152_s6 + $0x68] sm:$0xff]   ;;  %v1053_v18 = vld [vmem:[%s1152_s6 + $0x70] sm:$0xff]   ;;  %996 = vmatpush3.bf16.msra.mxu1 %v1058_v24 }
  0x16   : > { %v1054_v19 = vld [vmem:[%s1152_s6 + $0x78] sm:$0xff]   ;;  %997 = vmatprep.subr.bf16.mxu1 %v1087_v21 }
  0x19   : > { %998 = vmatpush3.bf16.msra.mxu1 %v1059_v25 }
  0x1a   : > { %999 = vmatprep.subr.bf16.mxu1 %v1087_v21 }
  0x1b   : > { %962 = vmatmul.mubr.msk.bf16.gmra.mrb[4].mxu0 %vm396_vm1, %v1042_v7 }
  0x1c   : > { %965 = vmatprep.mubr.msk.bf16.mxu0 %vm396_vm1, %v1043_v8 }
  0x1d   : > { %1000 = vmatpush3.bf16.msra.mxu1 %v1060_v26 }
  0x1e   : > { %1001 = vmatprep.subr.bf16.mxu1 %v1087_v21 }
  0x21   : > { %1002 = vmatpush3.bf16.msra.mxu1 %v1061_v27 }
  0x22   : > { %1003 = vmatprep.subr.bf16.mxu1 %v1087_v21 }
  0x23   : > { %966 = vmatmul.mubr.msk.bf16.gmra.mrb[8].mxu0 %vm396_vm1, %v1044_v9 }
  0x24   : > { %969 = vmatprep.mubr.msk.bf16.mxu0 %vm396_vm1, %v1045_v10 }
  0x25   : > { %1004 = vmatpush3.bf16.msra.mxu1 %v1062_v28 }
  0x2b   : > { %970 = vmatmul.mubr.msk.bf16.gmra.mrb[12].mxu0 %vm396_vm1, %v1046_v11 }
  0x2c   : > { %973 = vmatprep.mubr.msk.bf16.mxu0 %vm396_vm1, %v1047_v12 }
  0x33   : > { %974 = vmatmul.mubr.msk.bf16.gmra.mrb[16].mxu0 %vm396_vm1, %v1048_v13 }
  0x34   : > { %977 = vmatprep.mubr.msk.bf16.mxu0 %vm396_vm1, %v1049_v14 }
  0x3b   : > { %978 = vmatmul.mubr.msk.bf16.gmra.mrb[20].mxu0 %vm396_vm1, %v1050_v15 }
  0x3c   : > { %981 = vmatprep.mubr.msk.bf16.mxu0 %vm396_vm1, %v1051_v16 }
  0x43   : > { %982 = vmatmul.mubr.msk.bf16.gmra.mrb[24].mxu0 %vm396_vm1, %v1052_v17 }
  0x44   : > { %985 = vmatprep.mubr.msk.bf16.mxu0 %vm396_vm1, %v1053_v18 }
  0x4b   : > { %986 = vmatmul.mubr.msk.bf16.gmra.mrb[28].mxu0 %vm396_vm1, %v1054_v19 }
  0xe6   : > { %v959_v30 = vpop.f32.mrb[0].mxu0 }
  0xe7   : > { %v483_v31 = vpop.f32.mrb[1].mxu0  ;;  %v492_v35 = vadd.f32 %v959_v30, %v1213_v29 }
  0xe8   : > { %v484_v32 = vadd.f32 %v1213_v29, %v483_v31  ;;  %v960_v33 = vpop.f32.mrb[2].mxu0 }
  0xe9   : > { %v486_v34 = vpop.f32.mrb[3].mxu0  ;;  %v495_v38 = vadd.f32 %v960_v33, %v1213_v29  ;;  %v612_v40 = vmax.f32 %v492_v35, 0.0 }
  0xea   : > { %v487_v36 = vadd.f32 %v1213_v29, %v486_v34  ;;  %v610_v37 = vmax.f32 %v484_v32, 0.0 }
  0xeb   : > { %v613_v44 = vmax.f32 %v495_v38, 0.0 }
  0xec   : > { %v611_v39 = vmax.f32 %v487_v36, 0.0 }
  0xee   : > { %v643_v41 = vadd.f32 %v611_v39, %v610_v37  ;;  %v963_v42 = vpop.f32.mrb[4].mxu0 }
  0xef   : > { %v499_v43 = vpop.f32.mrb[5].mxu0  ;;  %v508_v49 = vadd.f32 %v963_v42, %v1213_v29 }
  0xf0   : > { %v644_v45 = vadd.f32 %v643_v41, %v612_v40  ;;  %v500_v46 = vadd.f32 %v1213_v29, %v499_v43  ;;  %v964_v47 = vpop.f32.mrb[6].mxu0 }
  0xf1   : > { %v502_v48 = vpop.f32.mrb[7].mxu0  ;;  %v511_v54 = vadd.f32 %v964_v47, %v1213_v29  ;;  %v616_v56 = vmax.f32 %v508_v49, 0.0 }
  0xf2   : > { %v614_v50 = vmax.f32 %v500_v46, 0.0  ;;  %v645_v51 = vadd.f32 %v644_v45, %v613_v44  ;;  %v503_v52 = vadd.f32 %v1213_v29, %v502_v48 }
  0xf3   : > { %v617_v60 = vmax.f32 %v511_v54, 0.0 }
  0xf4   : > { %v646_v53 = vadd.f32 %v645_v51, %v614_v50  ;;  %v615_v55 = vmax.f32 %v503_v52, 0.0 }
  0xf6   : > { %v647_v57 = vadd.f32 %v646_v53, %v615_v55  ;;  %v967_v58 = vpop.f32.mrb[8].mxu0 }
  0xf7   : > { %v515_v59 = vpop.f32.mrb[9].mxu0  ;;  %v524_v1 = vadd.f32 %v967_v58, %v1213_v29 }
  0xf8   : > { %v648_v61 = vadd.f32 %v647_v57, %v616_v56  ;;  %v516_v62 = vadd.f32 %v1213_v29, %v515_v59  ;;  %v968_v63 = vpop.f32.mrb[10].mxu0 }
  0xf9   : > { %v518_v0 = vpop.f32.mrb[11].mxu0  ;;  %v527_v6 = vadd.f32 %v968_v63, %v1213_v29  ;;  %v620_v8 = vmax.f32 %v524_v1, 0.0 }
  0xfa   : > { %v618_v2 = vmax.f32 %v516_v62, 0.0  ;;  %v649_v3 = vadd.f32 %v648_v61, %v617_v60  ;;  %v519_v4 = vadd.f32 %v1213_v29, %v518_v0 }
  0xfb   : > { %v621_v12 = vmax.f32 %v527_v6, 0.0 }
  0xfc   : > { %v650_v5 = vadd.f32 %v649_v3, %v618_v2  ;;  %v619_v7 = vmax.f32 %v519_v4, 0.0 }
  0xfe   : > { %v651_v9 = vadd.f32 %v650_v5, %v619_v7  ;;  %v971_v10 = vpop.f32.mrb[12].mxu0 }
  0xff   : > { %v531_v11 = vpop.f32.mrb[13].mxu0  ;;  %v540_v17 = vadd.f32 %v971_v10, %v1213_v29 }
 0x100   : > { %v652_v13 = vadd.f32 %v651_v9, %v620_v8  ;;  %v532_v14 = vadd.f32 %v1213_v29, %v531_v11  ;;  %v972_v15 = vpop.f32.mrb[14].mxu0 }
 0x101   : > { %v534_v16 = vpop.f32.mrb[15].mxu0  ;;  %v543_v22 = vadd.f32 %v972_v15, %v1213_v29  ;;  %v624_v24 = vmax.f32 %v540_v17, 0.0 }
 0x102   : > { %v622_v18 = vmax.f32 %v532_v14, 0.0  ;;  %v653_v19 = vadd.f32 %v652_v13, %v621_v12  ;;  %v535_v20 = vadd.f32 %v1213_v29, %v534_v16 }
 0x103   : > { %v625_v28 = vmax.f32 %v543_v22, 0.0 }
 0x104   : > { %v654_v21 = vadd.f32 %v653_v19, %v622_v18  ;;  %v623_v23 = vmax.f32 %v535_v20, 0.0 }
 0x106   : > { %v655_v25 = vadd.f32 %v654_v21, %v623_v23  ;;  %v975_v26 = vpop.f32.mrb[16].mxu0 }
 0x107   : > { %v547_v27 = vpop.f32.mrb[17].mxu0  ;;  %v556_v34 = vadd.f32 %v975_v26, %v1213_v29 }
 0x108   : > { %v656_v30 = vadd.f32 %v655_v25, %v624_v24  ;;  %v548_v31 = vadd.f32 %v1213_v29, %v547_v27  ;;  %v976_v32 = vpop.f32.mrb[18].mxu0 }
 0x109   : > { %v550_v33 = vpop.f32.mrb[19].mxu0  ;;  %v559_v39 = vadd.f32 %v976_v32, %v1213_v29  ;;  %v628_v41 = vmax.f32 %v556_v34, 0.0 }
 0x10a   : > { %v626_v35 = vmax.f32 %v548_v31, 0.0  ;;  %v657_v36 = vadd.f32 %v656_v30, %v625_v28  ;;  %v551_v37 = vadd.f32 %v1213_v29, %v550_v33 }
 0x10b   : > { %v629_v45 = vmax.f32 %v559_v39, 0.0 }
 0x10c   : > { %v658_v38 = vadd.f32 %v657_v36, %v626_v35  ;;  %v627_v40 = vmax.f32 %v551_v37, 0.0 }
 0x10e   : > { %v659_v42 = vadd.f32 %v658_v38, %v627_v40  ;;  %v979_v43 = vpop.f32.mrb[20].mxu0 }
 0x10f   : > { %v563_v44 = vpop.f32.mrb[21].mxu0  ;;  %v572_v50 = vadd.f32 %v979_v43, %v1213_v29 }
 0x110   : > { %v660_v46 = vadd.f32 %v659_v42, %v628_v41  ;;  %v564_v47 = vadd.f32 %v1213_v29, %v563_v44  ;;  %v980_v48 = vpop.f32.mrb[22].mxu0 }
 0x111   : > { %v566_v49 = vpop.f32.mrb[23].mxu0  ;;  %v575_v55 = vadd.f32 %v980_v48, %v1213_v29  ;;  %v632_v57 = vmax.f32 %v572_v50, 0.0 }
 0x112   : > { %v630_v51 = vmax.f32 %v564_v47, 0.0  ;;  %v661_v52 = vadd.f32 %v660_v46, %v629_v45  ;;  %v567_v53 = vadd.f32 %v1213_v29, %v566_v49 }
 0x113   : > { %v633_v61 = vmax.f32 %v575_v55, 0.0 }
 0x114   : > { %v662_v54 = vadd.f32 %v661_v52, %v630_v51  ;;  %v631_v56 = vmax.f32 %v567_v53, 0.0 }
 0x116   : > { %v663_v58 = vadd.f32 %v662_v54, %v631_v56  ;;  %v983_v59 = vpop.f32.mrb[24].mxu0 }
 0x117   : > { %v579_v60 = vpop.f32.mrb[25].mxu0  ;;  %v588_v2 = vadd.f32 %v983_v59, %v1213_v29 }
 0x118   : > { %v664_v62 = vadd.f32 %v663_v58, %v632_v57  ;;  %v580_v63 = vadd.f32 %v1213_v29, %v579_v60  ;;  %v984_v0 = vpop.f32.mrb[26].mxu0 }
 0x119   : > { %v582_v1 = vpop.f32.mrb[27].mxu0  ;;  %v591_v7 = vadd.f32 %v984_v0, %v1213_v29  ;;  %v636_v9 = vmax.f32 %v588_v2, 0.0 }
 0x11a   : > { %v634_v3 = vmax.f32 %v580_v63, 0.0  ;;  %v665_v4 = vadd.f32 %v664_v62, %v633_v61  ;;  %v583_v5 = vadd.f32 %v1213_v29, %v582_v1 }
 0x11b   : > { %v637_v13 = vmax.f32 %v591_v7, 0.0 }
 0x11c   : > { %v666_v6 = vadd.f32 %v665_v4, %v634_v3  ;;  %v635_v8 = vmax.f32 %v583_v5, 0.0 }
 0x11e   : > { %v667_v10 = vadd.f32 %v666_v6, %v635_v8  ;;  %v987_v11 = vpop.f32.mrb[28].mxu0 }
 0x11f   : > { %v595_v12 = vpop.f32.mrb[29].mxu0  ;;  %v604_v18 = vadd.f32 %v987_v11, %v1213_v29 }
 0x120   : > { %v668_v14 = vadd.f32 %v667_v10, %v636_v9  ;;  %v596_v15 = vadd.f32 %v1213_v29, %v595_v12  ;;  %v988_v16 = vpop.f32.mrb[30].mxu0 }
 0x121   : > { %v598_v17 = vpop.f32.mrb[31].mxu0  ;;  %v607_v23 = vadd.f32 %v988_v16, %v1213_v29  ;;  %v640_v25 = vmax.f32 %v604_v18, 0.0 }
 0x122   : > { %v638_v19 = vmax.f32 %v596_v15, 0.0  ;;  %v669_v20 = vadd.f32 %v668_v14, %v637_v13  ;;  %v599_v21 = vadd.f32 %v1213_v29, %v598_v17  ;;  %v911_v29 = vld [vmem:[%s1267_s4] ss:$0 sm:$0xff] }
 0x123   : > { %v641_v27 = vmax.f32 %v607_v23, 0.0 }
 0x124   : > { %v670_v22 = vadd.f32 %v669_v20, %v638_v19  ;;  %v639_v24 = vmax.f32 %v599_v21, 0.0 }
 0x126   : > { %v671_v26 = vadd.f32 %v670_v22, %v639_v24 }
 0x128   : > { %v672_v28 = vadd.f32 %v671_v26, %v640_v25 }
 0x12a   : > { %v673_v30 = vadd.f32 %v672_v28, %v641_v27 }
 0x12c   : > { %v680_v31 = vrot.slane %v673_v30, 4 }
 0x12e   : > { %v681_v32 = vadd.f32 %v680_v31, %v673_v30 }
 0x130   : > { %v682_v33 = vrot.slane %v681_v32, 2 }
 0x132   : > { %v683_v34 = vadd.f32 %v682_v33, %v681_v32 }
 0x134   : > { %v684_v35 = vrot.slane %v683_v34, 1 }
 0x136   : > { %v685_v36 = vadd.f32 %v684_v35, %v683_v34 }
 0x138   : > { %v686_v37 = vmul.f32 0.00390625, %v685_v36 }
 0x13a   : > { %v687_v38 = vpack.c.bf16 %v686_v37, %v686_v37 }
 0x13c   : > { %1006 = vmatmul.mubr.bf16.vlgmr.msra.gmra.mrb[0].mxu1 %v687_v38 }
 0x20f   : > { %v793_v39 = vpop.f32.mrb[0].mxu1 }
 0x210   : > { %v794_v40 = vadd.f32 %v911_v29, %v793_v39  ;;  %v1007_v41 = vpop.f32.mrb[1].mxu1 }
 0x211   : > { %v796_v42 = vpop.f32.mrb[2].mxu1 }
 0x212   : > { %799 = vst [vmem:[%s250_s9] sm:$0xff] %v794_v40  ;;  %v1008_v43 = vpop.f32.mrb[3].mxu1 }
 0x213 PF: > { %s15_s20 = sadd.s32 1, %s1085_s20   ;;  %s1269_s18 = smov %s1081_s19 }
 0x214   : > { %p12_p5 = scmp.ge.s32.totalorder %s15_s20, 4   ;;  %s1270_s19 = smov %s1272_s21 }
 0x216   :  { %14 = sbr.rel (!%p12_p5) target bundleno = 2 (0x2), region = 78 }

</bundles_post_ra>
